<compile_context>
chip_gen: v7x
topology: tpu7x:2x2x1
jax: 0.10.0
libtpu: 0.0.40
codegen_flags: <defaults>
</compile_context>

<pallas_src>
import functools

import jax
import jax.numpy as jnp
from jax.experimental import pallas as pl
from jax.experimental.pallas import tpu as pltpu

NUM_BINS = 50
BIN_WIDTH = 0.02
EPS = 1e-6  # mmdet bbox_overlaps default eps


def _round_up(x, m):
    return ((x + m - 1) // m) * m


def _p2b_iou_kernel(p_ref, g_ref, max_ref, *, num_valid_p, p_pad):
    """One (Gt, P_pad) tile of aligned IoU followed by a per-row (lane) max.

    p_ref:   (4, Gt, P_pad) pseudo-box coordinate planes (x1, y1, x2, y2),
             proposals on the lane axis (lane-dense, padded to 128k lanes).
    g_ref:   (4, Gt, 1)     gt-box coordinate planes; G on the sublane axis so
             the broadcast across the proposal/lane axis is free.
    max_ref: (Gt, 1)        per-gt best IoU kept in its natural layout.
    """
    px1 = p_ref[0]
    py1 = p_ref[1]
    px2 = p_ref[2]
    py2 = p_ref[3]

    gx1 = g_ref[0]
    gy1 = g_ref[1]
    gx2 = g_ref[2]
    gy2 = g_ref[3]

    area_p = (px2 - px1) * (py2 - py1)                 # (Gt, P_pad)
    area_g = (gx2 - gx1) * (gy2 - gy1)                 # (Gt, 1)

    w = jnp.maximum(jnp.minimum(px2, gx2) - jnp.maximum(px1, gx1), 0.0)
    h = jnp.maximum(jnp.minimum(py2, gy2) - jnp.maximum(py1, gy1), 0.0)
    overlap = w * h                                    # (Gt, P_pad)

    union = jnp.maximum(area_p + area_g - overlap, EPS)
    # Approximate reciprocal runs on the otherwise-idle EUP slot; one Newton
    # step restores ~f32 accuracy so the exact-divide reference still matches.
    inv_u = pl.reciprocal(union, approx=True)
    inv_u = inv_u * (2.0 - union * inv_u)
    iou = overlap * inv_u                              # (Gt, P_pad)

    # Mask lane padding (padded proposals must never win the max; IoU >= 0).
    if num_valid_p < p_pad:
        lane = jax.lax.broadcasted_iota(jnp.int32, iou.shape, 1)
        iou = jnp.where(lane < num_valid_p, iou, -1.0)

    # Lane-axis reduce naturally leaves one scalar per sublane -> (Gt, 1).
    max_ref[...] = jnp.max(iou, axis=1, keepdims=True)


def p2b_iou(pseudo_boxes_list, gt_bboxes_list):
    """Mirrors Test_P2B_iou.forward's compute (stats returned, not printed).

    Returns (max_iou (num_gt,), sum_iou scalar f32, iou_bin (50,) int32).
    """
    gt_cat = jnp.concatenate(gt_bboxes_list, axis=0).astype(jnp.float32)   # (G, 4)
    G = gt_cat.shape[0]
    ps_cat = jnp.concatenate(pseudo_boxes_list, axis=0).astype(jnp.float32)
    ps = ps_cat.reshape(G, -1, 4)                                          # (G, P, 4)
    P = ps.shape[1]

    # Lane-dense proposal axis.
    P_pad = _round_up(max(P, 128), 128)

    # Cap the sublane block so 4 planes x Gt x P_pad x 4B stays ~4 MiB/buffer:
    # double-buffered pseudo tiles remain well under the scoped-VMEM default
    # on every chip (incl. v7x's 64 MiB physical VMEM).
    gt_cap = max(8, ((4 * 1024 * 1024) // (16 * P_pad)) // 8 * 8)
    Gt = min(gt_cap, _round_up(G, 8))
    G_pad = _round_up(G, Gt)

    # TODO(synk): producing/storing boxes coordinate-major upstream would
    # remove this HBM transpose round-trip before the kernel.
    p_cm = jnp.transpose(ps, (2, 0, 1))                                    # (4, G, P)
    p_cm = jnp.pad(p_cm, ((0, 0), (0, G_pad - G), (0, P_pad - P)))
    g_cm = jnp.transpose(gt_cat, (1, 0))[:, :, None]                       # (4, G, 1)
    g_cm = jnp.pad(g_cm, ((0, 0), (0, G_pad - G), (0, 0)))

    kernel = functools.partial(_p2b_iou_kernel, num_valid_p=P, p_pad=P_pad)

    max_iou_col = pl.pallas_call(
        kernel,
        out_shape=jax.ShapeDtypeStruct((G_pad, 1), jnp.float32),
        grid=(G_pad // Gt,),
        in_specs=[
            pl.BlockSpec((4, Gt, P_pad), lambda i: (0, i, 0)),
            pl.BlockSpec((4, Gt, 1), lambda i: (0, i, 0)),
        ],
        out_specs=pl.BlockSpec((Gt, 1), lambda i: (i, 0)),
        compiler_params=pltpu.CompilerParams(
            dimension_semantics=("parallel",),
        ),
    )(p_cm, g_cm)

    max_iou = max_iou_col[:G, 0]                                           # (G,)

    # Scalar sum + 50-bin histogram on just G floats: plain JAX in the wrapper
    # (removes one-hot/XLU work and masked partial stores from the kernel).
    sum_iou = jnp.sum(max_iou)
    bins = jnp.minimum(jnp.floor(max_iou / BIN_WIDTH).astype(jnp.int32),
                       NUM_BINS - 1)
    hist = jnp.zeros((NUM_BINS,), jnp.int32).at[bins].add(1)
    return max_iou, sum_iou, hist


class TestP2BIouState:
    """Running statistics, mirroring the PyTorch module's buffers."""

    def __init__(self):
        self.sum_iou = jnp.float32(0.0)
        self.sum_num = 0
        self.iou_bin = jnp.zeros((NUM_BINS,), jnp.int32)

    def forward(self, pseudo_boxes_list, gt_bboxes_list):
        max_iou, s, hist = p2b_iou(pseudo_boxes_list, gt_bboxes_list)
        self.sum_iou = self.sum_iou + s
        self.sum_num = self.sum_num + int(max_iou.shape[0])
        self.iou_bin = self.iou_bin + hist
        return max_iou


def _reference(pseudo_boxes_list, gt_bboxes_list):
    gt = jnp.concatenate(gt_bboxes_list, axis=0).astype(jnp.float32)
    G = gt.shape[0]
    ps = jnp.concatenate(pseudo_boxes_list, axis=0).astype(jnp.float32).reshape(G, -1, 4)
    gtb = gt[:, None, :]
    area_p = (ps[..., 2] - ps[..., 0]) * (ps[..., 3] - ps[..., 1])
    area_g = (gtb[..., 2] - gtb[..., 0]) * (gtb[..., 3] - gtb[..., 1])
    w = jnp.maximum(jnp.minimum(ps[..., 2], gtb[..., 2]) - jnp.maximum(ps[..., 0], gtb[..., 0]), 0.0)
    h = jnp.maximum(jnp.minimum(ps[..., 3], gtb[..., 3]) - jnp.maximum(ps[..., 1], gtb[..., 1]), 0.0)
    ov = w * h
    iou = ov / jnp.maximum(area_p + area_g - ov, EPS)
    return jnp.max(iou, axis=1)


if __name__ == "__main__":
    key = jax.random.PRNGKey(0)
    k1, k2, k3, k4 = jax.random.split(key, 4)

    # Two "images", 3 + 5 = 8 GT boxes, P = 16 proposals per GT.
    P = 16

    def make_boxes(k, n):
        xy = jax.random.uniform(k, (n, 2), minval=0.0, maxval=50.0)
        wh = jax.random.uniform(jax.random.fold_in(k, 1), (n, 2), minval=4.0, maxval=30.0)
        return jnp.concatenate([xy, xy + wh], axis=-1).astype(jnp.float32)

    gt_bboxes = [make_boxes(k1, 3), make_boxes(k2, 5)]

    def make_pseudo(k, gt):
        noise = jax.random.uniform(k, (gt.shape[0], P, 4), minval=-6.0, maxval=6.0)
        ps = gt[:, None, :] + noise
        x1 = jnp.minimum(ps[..., 0], ps[..., 2]); x2 = jnp.maximum(ps[..., 0], ps[..., 2])
        y1 = jnp.minimum(ps[..., 1], ps[..., 3]); y2 = jnp.maximum(ps[..., 1], ps[..., 3])
        return jnp.stack([x1, y1, x2, y2], axis=-1).reshape(-1, 4).astype(jnp.float32)

    pseudo_boxes = [make_pseudo(k3, gt_bboxes[0]), make_pseudo(k4, gt_bboxes[1])]

    module = TestP2BIouState()
    max_iou = module.forward(pseudo_boxes, gt_bboxes)
    jax.block_until_ready(max_iou)
    jax.block_until_ready(module.iou_bin)
    jax.block_until_ready(module.sum_iou)

    # Correctness vs pure-JAX exact-divide reference (approx recip + Newton
    # step keeps ~1e-6 abs error on IoU in [0, 1]; 1e-4 gives margin).
    ref = _reference(pseudo_boxes, gt_bboxes)
    assert jnp.allclose(max_iou, ref, atol=1e-4), (max_iou, ref)
    assert int(jnp.sum(module.iou_bin)) == module.sum_num
    assert abs(float(module.sum_iou) - float(jnp.sum(ref))) < 1e-3

    print("KERNEL_OK")
</pallas_src>

<mosaic_0001>
module attributes {stable_mosaic.version = 11 : i64} {
  func.func @_p2b_iou_kernel(%arg0: i32, %arg1: memref<4x8x128xf32, #tpu.memory_space<vmem>>, %arg2: memref<4x8x1xf32, #tpu.memory_space<vmem>>, %arg3: memref<8x1xf32, #tpu.memory_space<vmem>>) attributes {dimension_semantics = [#tpu.dimension_semantics<parallel>], iteration_bounds = array<i64: 1>, scalar_prefetch = 0 : i64, scratch_operands = 0 : i64, tpu.core_type = #tpu.core_type<tc>, window_params = [{transform_indices = @transform_0, window_bounds = array<i64: 4, 8, 128>}, {transform_indices = @transform_1, window_bounds = array<i64: 4, 8, 1>}, {transform_indices = @transform_2, window_bounds = array<i64: 8, 1>}]} {
    %c0 = arith.constant 0 : index
    %c0_0 = arith.constant 0 : index
    %c0_1 = arith.constant 0 : index
    %0 = vector.load %arg1[%c0, %c0_0, %c0_1] : memref<4x8x128xf32, #tpu.memory_space<vmem>>, vector<1x8x128xf32>
    %1 = vector.shape_cast %0 : vector<1x8x128xf32> to vector<8x128xf32>
    %c1 = arith.constant 1 : index
    %c0_2 = arith.constant 0 : index
    %c0_3 = arith.constant 0 : index
    %2 = vector.load %arg1[%c1, %c0_2, %c0_3] : memref<4x8x128xf32, #tpu.memory_space<vmem>>, vector<1x8x128xf32>
    %3 = vector.shape_cast %2 : vector<1x8x128xf32> to vector<8x128xf32>
    %c2 = arith.constant 2 : index
    %c0_4 = arith.constant 0 : index
    %c0_5 = arith.constant 0 : index
    %4 = vector.load %arg1[%c2, %c0_4, %c0_5] : memref<4x8x128xf32, #tpu.memory_space<vmem>>, vector<1x8x128xf32>
    %5 = vector.shape_cast %4 : vector<1x8x128xf32> to vector<8x128xf32>
    %c3 = arith.constant 3 : index
    %c0_6 = arith.constant 0 : index
    %c0_7 = arith.constant 0 : index
    %6 = vector.load %arg1[%c3, %c0_6, %c0_7] : memref<4x8x128xf32, #tpu.memory_space<vmem>>, vector<1x8x128xf32>
    %7 = vector.shape_cast %6 : vector<1x8x128xf32> to vector<8x128xf32>
    %c0_8 = arith.constant 0 : index
    %c0_9 = arith.constant 0 : index
    %c0_10 = arith.constant 0 : index
    %8 = vector.load %arg2[%c0_8, %c0_9, %c0_10] : memref<4x8x1xf32, #tpu.memory_space<vmem>>, vector<1x8x1xf32>
    %9 = vector.shape_cast %8 : vector<1x8x1xf32> to vector<8x1xf32>
    %c1_11 = arith.constant 1 : index
    %c0_12 = arith.constant 0 : index
    %c0_13 = arith.constant 0 : index
    %10 = vector.load %arg2[%c1_11, %c0_12, %c0_13] : memref<4x8x1xf32, #tpu.memory_space<vmem>>, vector<1x8x1xf32>
    %11 = vector.shape_cast %10 : vector<1x8x1xf32> to vector<8x1xf32>
    %c2_14 = arith.constant 2 : index
    %c0_15 = arith.constant 0 : index
    %c0_16 = arith.constant 0 : index
    %12 = vector.load %arg2[%c2_14, %c0_15, %c0_16] : memref<4x8x1xf32, #tpu.memory_space<vmem>>, vector<1x8x1xf32>
    %13 = vector.shape_cast %12 : vector<1x8x1xf32> to vector<8x1xf32>
    %c3_17 = arith.constant 3 : index
    %c0_18 = arith.constant 0 : index
    %c0_19 = arith.constant 0 : index
    %14 = vector.load %arg2[%c3_17, %c0_18, %c0_19] : memref<4x8x1xf32, #tpu.memory_space<vmem>>, vector<1x8x1xf32>
    %15 = vector.shape_cast %14 : vector<1x8x1xf32> to vector<8x1xf32>
    %16 = arith.subf %5, %1 : vector<8x128xf32>
    %17 = arith.subf %7, %3 : vector<8x128xf32>
    %18 = arith.mulf %16, %17 : vector<8x128xf32>
    %19 = arith.subf %13, %9 : vector<8x1xf32>
    %20 = arith.subf %15, %11 : vector<8x1xf32>
    %21 = arith.mulf %19, %20 : vector<8x1xf32>
    %22 = vector.broadcast %13 : vector<8x1xf32> to vector<8x128xf32>
    %23 = arith.minimumf %5, %22 : vector<8x128xf32>
    %24 = vector.broadcast %9 : vector<8x1xf32> to vector<8x128xf32>
    %25 = arith.maximumf %1, %24 : vector<8x128xf32>
    %26 = arith.subf %23, %25 : vector<8x128xf32>
    %cst = arith.constant 0.000000e+00 : f32
    %27 = vector.broadcast %cst : f32 to vector<8x128xf32>
    %28 = arith.maximumf %26, %27 : vector<8x128xf32>
    %29 = vector.broadcast %15 : vector<8x1xf32> to vector<8x128xf32>
    %30 = arith.minimumf %7, %29 : vector<8x128xf32>
    %31 = vector.broadcast %11 : vector<8x1xf32> to vector<8x128xf32>
    %32 = arith.maximumf %3, %31 : vector<8x128xf32>
    %33 = arith.subf %30, %32 : vector<8x128xf32>
    %cst_20 = arith.constant 0.000000e+00 : f32
    %34 = vector.broadcast %cst_20 : f32 to vector<8x128xf32>
    %35 = arith.maximumf %33, %34 : vector<8x128xf32>
    %36 = arith.mulf %28, %35 : vector<8x128xf32>
    %37 = vector.broadcast %21 : vector<8x1xf32> to vector<8x128xf32>
    %38 = arith.addf %18, %37 : vector<8x128xf32>
    %39 = arith.subf %38, %36 : vector<8x128xf32>
    %cst_21 = arith.constant 9.99999997E-7 : f32
    %40 = vector.broadcast %cst_21 : f32 to vector<8x128xf32>
    %41 = arith.maximumf %39, %40 : vector<8x128xf32>
    %42 = tpu.reciprocal %41 {approx = true} : vector<8x128xf32> -> vector<8x128xf32>
    %43 = arith.mulf %41, %42 : vector<8x128xf32>
    %cst_22 = arith.constant 2.000000e+00 : f32
    %44 = vector.broadcast %cst_22 : f32 to vector<8x128xf32>
    %45 = arith.subf %44, %43 : vector<8x128xf32>
    %46 = arith.mulf %42, %45 : vector<8x128xf32>
    %47 = arith.mulf %36, %46 : vector<8x128xf32>
    %48 = tpu.iota {dimensions = array<i32: 1>} : vector<8x128xi32>
    %c16_i32 = arith.constant 16 : i32
    %49 = vector.broadcast %c16_i32 : i32 to vector<8x128xi32>
    %50 = arith.cmpi slt, %48, %49 : vector<8x128xi32>
    %cst_23 = arith.constant -1.000000e+00 : f32
    %51 = vector.broadcast %cst_23 : f32 to vector<8x128xf32>
    %52 = arith.select %50, %47, %51 : vector<8x128xi1>, vector<8x128xf32>
    %cst_24 = arith.constant dense<0xFF800000> : vector<8xf32>
    %53 = vector.multi_reduction <maximumf>, %52, %cst_24 [1] : vector<8x128xf32> to vector<8xf32>
    %54 = vector.shape_cast %53 : vector<8xf32> to vector<8x1xf32>
    %c0_25 = arith.constant 0 : index
    %c0_26 = arith.constant 0 : index
    %55 = vector.load %arg3[%c0_25, %c0_26] : memref<8x1xf32, #tpu.memory_space<vmem>>, vector<8x1xf32>
    tpu.vector_store %arg3[%c0_25, %c0_26], %54 {strides = array<i32>} : memref<8x1xf32, #tpu.memory_space<vmem>>, vector<8x1xf32>,
    return
  }
  func.func @transform_0(%arg0: i32) -> (i32, i32, i32) {
    %c0_i32 = arith.constant 0 : i32
    %c0_i32_0 = arith.constant 0 : i32
    %c0_i32_1 = arith.constant 0 : i32
    return %c0_i32, %arg0, %c0_i32_0 : i32, i32, i32
  }
  func.func @transform_1(%arg0: i32) -> (i32, i32, i32) {
    %c0_i32 = arith.constant 0 : i32
    %c0_i32_0 = arith.constant 0 : i32
    %c0_i32_1 = arith.constant 0 : i32
    return %c0_i32, %arg0, %c0_i32_0 : i32, i32, i32
  }
  func.func @transform_2(%arg0: i32) -> (i32, i32) {
    %c0_i32 = arith.constant 0 : i32
    %c0_i32_0 = arith.constant 0 : i32
    return %arg0, %c0_i32 : i32, i32
  }
}

</mosaic_0001>

<bundles_post_ra>
// kernel: tpu_custom_call.1
= control target key start
LH: loop header
LB: loop body
LE: loop exit
PB: predicated region body
PF: predicated region fallthrough
CT: control target
= control target key end

     0   :  { %v96_v0 = vmov 0   ;;  %v73_v32 = vlaneseq  ;;  %vm79_vm1 = vcmask 7168   ;;  %s139_s1 = inlined_call_operand.vmem [shape: f32[4,8,1], index: 1, kind: input, shape index: {}]   ;;  %s140_s0 = inlined_call_operand.vmem [shape: f32[4,8,128], index: 0, kind: input, shape index: {}]   ;;  %s141_s2 = inlined_call_operand.vmem [shape: f32[8,1], index: 2, kind: output, shape index: {}]  }
   0x1   :  { %93 = vset.pattern.permute.xlu1 %v96_v0  ;;  %92 = vset.pattern.permute.xlu0 %v96_v0  ;;  %v90_v1 = vld [vmem:[%s139_s1 + $0x18] sm:$0xff]  ;;  %v88_v2 = vld [vmem:[%s139_s1 + $0x8] sm:$0xff]  ;;  %v89_v3 = vld [vmem:[%s139_s1 + $0x10] sm:$0xff] }
   0x2   :  { %47 = vperm.xlu1 %93, %v90_v1   ;;  %v29_v4 = vsub.f32 %v90_v1, %v88_v2  ;;  %33 = vperm.xlu0 %92, %v89_v3   ;;  %v18_v5 = vld [vmem:[%s139_s1] sm:$0xff]  ;;  %v85_v10 = vld [vmem:[%s140_s0 + $0x8] sm:$0xff]  ;;  %v87_v12 = vld [vmem:[%s140_s0 + $0x18] sm:$0xff]  ;;  %v74_v35 = vand.u32 127, %v73_v32 }
   0x3   :  { %v28_v6 = vsub.f32 %v89_v3, %v18_v5  ;;  %v11_v11 = vld [vmem:[%s140_s0] sm:$0xff]  ;;  %v86_v13 = vld [vmem:[%s140_s0 + $0x10] sm:$0xff]  ;;  %v26_v14 = vsub.f32 %v87_v12, %v85_v10 }
   0x4   :  { %v25_v15 = vsub.f32 %v86_v13, %v11_v11  ;;  %vm75_vm0 = vcmp.lt.s32.totalorder %v74_v35, 16 }
   0x5   :  { %v30_v7 = vmul.f32 %v29_v4, %v28_v6 }
   0x6   :  { %53 = vperm.xlu1 %93, %v88_v2   ;;  %39 = vperm.xlu0 %92, %v18_v5   ;;  %v27_v24 = vmul.f32 %v26_v14, %v25_v15 }
   0xa   :  { %62 = vperm.xlu0 %92, %v30_v7  }
  0x81   :  { %v48_v8 = vpop.permute.xlu1 %47  ;;  %v34_v9 = vpop.permute.xlu0 %33 }
  0x82   :  { %v50_v18 = vmin.f32 %v87_v12, %v48_v8  ;;  %v36_v19 = vmin.f32 %v86_v13, %v34_v9 }
  0x85   :  { %v54_v16 = vpop.permute.xlu1 %53  ;;  %v40_v17 = vpop.permute.xlu0 %39 }
  0x86   :  { %v56_v20 = vmax.f32 %v85_v10, %v54_v16  ;;  %v42_v21 = vmax.f32 %v11_v11, %v40_v17 }
  0x88   :  { %v57_v22 = vsub.f32 %v50_v18, %v56_v20  ;;  %v43_v23 = vsub.f32 %v36_v19, %v42_v21 }
  0x89   :  { %v63_v25 = vpop.permute.xlu0 %62 }
  0x8a   :  { %v58_v26 = vmax.f32 %v57_v22, 0.0  ;;  %v44_v27 = vmax.f32 %v43_v23, 0.0  ;;  %v65_v29 = vadd.f32 %v63_v25, %v27_v24 }
  0x8c   :  { %v59_v28 = vmul.f32 %v58_v26, %v44_v27 }
  0x8e   :  { %v66_v30 = vsub.f32 %v65_v29, %v59_v28 }
  0x90   :  { %v67_v31 = vmax.f32 %v66_v30, 1e-06 }
  0x92   :  { %94 = vrcp.f32 %v67_v31 }
  0x9c   :  { %v95_v33 = vpop.eup %94 }
  0x9d   :  { %v69_v34 = vmul.f32 %v95_v33, %v67_v31 }
  0x9f   :  { %v70_v36 = vsub.f32 2.0, %v69_v34 }
  0xa1   :  { %v71_v37 = vmul.f32 %v95_v33, %v70_v36 }
  0xa3   :  { %v72_v38 = vmul.f32 %v71_v37, %v59_v28 }
  0xa5   :  { %v76_v39 = vsel %vm75_vm0, %v72_v38, -1.0 }
  0xa6   :  { %77 = vmax.xlane.f32.xlu1 %v76_v39 }
 0x133   :  { %v78_v40 = vpop.xlane.xlu1 %77 }
 0x134   :  { %80 = vst.msk [vmem:[%s141_s2] sm:$0xff] %vm79_vm1, %v78_v40 }

</bundles_post_ra>
